<compile_context>
chip_gen: v6e
topology: v6e:2x2x1
jax: 0.10.0
libtpu: 0.0.40
codegen_flags: <defaults>
</compile_context>

<pallas_src>
import math

import jax
import jax.numpy as jnp
from jax.experimental import pallas as pl
from jax.experimental.pallas import tpu as pltpu


def _round_up(x, m):
    return ((x + m - 1) // m) * m


def _ffn_kernel(x_ref, w1_ref, b1_ref, w2_ref, b2_ref, o_ref, acc_ref):
    """One (tm, d_model) output tile; d_ff streamed in tff chunks along grid axis 1."""
    k = pl.program_id(1)

    @pl.when(k == 0)
    def _():
        acc_ref[...] = jnp.zeros_like(acc_ref)

    # h_chunk = relu(x @ W1[:, chunk] + b1[chunk])   (f32 accumulate on the MXU)
    h = jnp.dot(x_ref[...], w1_ref[...], preferred_element_type=jnp.float32)
    h = jnp.maximum(h + b1_ref[...], 0.0)            # (tm, tff) + (1, tff) broadcast, f32

    # Dropout: module evaluated in inference mode -> identity.
    # TODO(synk): training-mode dropout (pltpu.prng_seed + pltpu.prng_random_bits mask,
    #             scaled by 1/(1-p)) is not wired in.

    # acc += h_chunk @ W2[chunk, :]
    acc_ref[...] += jnp.dot(h.astype(w2_ref.dtype), w2_ref[...],
                            preferred_element_type=jnp.float32)

    @pl.when(k == pl.num_programs(1) - 1)
    def _():
        o_ref[...] = (acc_ref[...] + b2_ref[...]).astype(o_ref.dtype)


def feed_forward_block(x, w1, b1, w2, b2, *, tm=256, tff=512,
                       compute_dtype=jnp.bfloat16):
    """x: (batch, seq, d_model) float32. Returns same shape/dtype."""
    batch, seq, d_model = x.shape
    d_ff = w1.shape[1]
    M = batch * seq

    # Row tile: as large as possible (multiple of 8 sublanes), capped by the input size.
    tm_eff = min(tm, _round_up(M, 8))
    M_pad = _round_up(M, tm_eff)

    # d_ff tile: multiple of 128 lanes that divides d_ff, else fall back to full d_ff.
    tff_eff = min(tff, d_ff)
    if d_ff % tff_eff != 0 or (tff_eff % 128 != 0 and tff_eff != d_ff):
        tff_eff = d_ff

    x2d = x.reshape(M, d_model)
    if M_pad != M:
        x2d = jnp.pad(x2d, ((0, M_pad - M), (0, 0)))

    cdt = compute_dtype
    x2d = x2d.astype(cdt)
    w1c = w1.astype(cdt)
    w2c = w2.astype(cdt)
    b1f = b1.astype(jnp.float32)
    b2f = b2.astype(jnp.float32)

    # VMEM budget (double-buffered pipelined blocks + f32 accumulator) with headroom,
    # capped below v7x's 64 MiB physical VMEM.
    csize = jnp.dtype(cdt).itemsize
    osize = jnp.dtype(x.dtype).itemsize
    vmem_bytes = (
        2 * tm_eff * d_model * csize        # x tile
        + 2 * d_model * tff_eff * csize     # W1 column chunk
        + 2 * tff_eff * 4                   # b1 chunk (f32)
        + 2 * tff_eff * d_model * csize     # W2 row chunk
        + 2 * d_model * 4                   # b2 (f32)
        + 2 * tm_eff * d_model * osize      # output tile
        + tm_eff * d_model * 4              # f32 accumulator scratch
    )
    vmem_limit = min(max(int(1.5 * vmem_bytes) + (4 << 20), 16 << 20), 60 << 20)

    cost = pl.CostEstimate(
        flops=4 * M_pad * d_model * d_ff,   # two matmuls, 2*M*K*N each
        transcendentals=0,
        bytes_accessed=(M_pad * d_model * csize
                        + d_model * d_ff * csize
                        + d_ff * d_model * csize
                        + d_ff * 4 + d_model * 4
                        + M_pad * d_model * osize),
    )

    out2d = pl.pallas_call(
        _ffn_kernel,
        out_shape=jax.ShapeDtypeStruct((M_pad, d_model), x.dtype),
        grid_spec=pltpu.PrefetchScalarGridSpec(
            num_scalar_prefetch=0,
            grid=(M_pad // tm_eff, d_ff // tff_eff),
            in_specs=[
                pl.BlockSpec((tm_eff, d_model), lambda i, k: (i, 0)),    # x rows
                pl.BlockSpec((d_model, tff_eff), lambda i, k: (0, k)),   # W1 col chunk
                pl.BlockSpec((1, tff_eff), lambda i, k: (0, k)),         # b1 chunk
                pl.BlockSpec((tff_eff, d_model), lambda i, k: (k, 0)),   # W2 row chunk
                pl.BlockSpec((1, d_model), lambda i, k: (0, 0)),         # b2
            ],
            out_specs=pl.BlockSpec((tm_eff, d_model), lambda i, k: (i, 0)),
            scratch_shapes=[pltpu.VMEM((tm_eff, d_model), jnp.float32)],
        ),
        compiler_params=pltpu.CompilerParams(
            dimension_semantics=("parallel", "arbitrary"),
            vmem_limit_bytes=vmem_limit,
        ),
        cost_estimate=cost,
    )(x2d, w1c, b1f, w2c, b2f)

    if M_pad != M:
        out2d = out2d[:M]
    return out2d.reshape(batch, seq, d_model)


def init_params(key, d_model, d_ff):
    """Deterministic init mimicking nn.Linear default U(-1/sqrt(fan_in), 1/sqrt(fan_in))."""
    k1, k2, k3, k4 = jax.random.split(key, 4)
    bound1 = 1.0 / math.sqrt(d_model)
    bound2 = 1.0 / math.sqrt(d_ff)
    # Stored already transposed relative to PyTorch's (out, in) convention.
    w1 = jax.random.uniform(k1, (d_model, d_ff), jnp.float32, -bound1, bound1)
    b1 = jax.random.uniform(k2, (1, d_ff), jnp.float32, -bound1, bound1)
    w2 = jax.random.uniform(k3, (d_ff, d_model), jnp.float32, -bound2, bound2)
    b2 = jax.random.uniform(k4, (1, d_model), jnp.float32, -bound2, bound2)
    return w1, b1, w2, b2


if __name__ == "__main__":
    key = jax.random.PRNGKey(0)
    # Small but lane-dense shapes (d_model, d_ff multiples of 128); seq=10 exercises row padding.
    batch, seq, d_model, d_ff = 2, 10, 128, 256

    kx, kp = jax.random.split(key)
    x = jax.random.normal(kx, (batch, seq, d_model), jnp.float32)
    w1, b1, w2, b2 = init_params(kp, d_model, d_ff)

    out = feed_forward_block(x, w1, b1, w2, b2)
    out = jax.block_until_ready(out)

    # Reference mirrors the kernel's arithmetic (bf16 MXU operands, f32 accumulation).
    xc = x.reshape(-1, d_model).astype(jnp.bfloat16).astype(jnp.float32)
    w1c = w1.astype(jnp.bfloat16).astype(jnp.float32)
    w2c = w2.astype(jnp.bfloat16).astype(jnp.float32)
    h = jnp.maximum(xc @ w1c + b1, 0.0)
    ref = (h.astype(jnp.bfloat16).astype(jnp.float32) @ w2c + b2).reshape(
        batch, seq, d_model)

    assert out.shape == (batch, seq, d_model)
    assert jnp.allclose(out, ref, atol=1e-2, rtol=1e-2), float(
        jnp.max(jnp.abs(out - ref)))
    print("KERNEL_OK")
</pallas_src>

<mosaic_0001>
module attributes {stable_mosaic.version = 11 : i64} {
  func.func @_ffn_kernel(%arg0: i32, %arg1: i32, %arg2: memref<24x128xbf16, #tpu.memory_space<vmem>>, %arg3: memref<128x256xbf16, #tpu.memory_space<vmem>>, %arg4: memref<1x256xf32, #tpu.memory_space<vmem>>, %arg5: memref<256x128xbf16, #tpu.memory_space<vmem>>, %arg6: memref<1x128xf32, #tpu.memory_space<vmem>>, %arg7: memref<24x128xf32, #tpu.memory_space<vmem>>, %arg8: memref<24x128xf32, #tpu.memory_space<vmem>>) attributes {dimension_semantics = [#tpu.dimension_semantics<parallel>, #tpu.dimension_semantics<arbitrary>], iteration_bounds = array<i64: 1, 1>, scalar_prefetch = 0 : i64, scratch_operands = 1 : i64, tpu.core_type = #tpu.core_type<tc>, window_params = [{transform_indices = @transform_0, window_bounds = array<i64: 24, 128>}, {transform_indices = @transform_1, window_bounds = array<i64: 128, 256>}, {transform_indices = @transform_2, window_bounds = array<i64: 1, 256>}, {transform_indices = @transform_3, window_bounds = array<i64: 256, 128>}, {pipeline_mode = #tpu.pipeline_mode<synchronous>, transform_indices = @transform_4, window_bounds = array<i64: 1, 128>}, {transform_indices = @transform_5, window_bounds = array<i64: 24, 128>}]} {
    %c0_i32 = arith.constant 0 : i32
    %0 = arith.cmpi eq, %arg1, %c0_i32 : i32
    %1 = arith.extui %0 : i1 to i32
    %c0_i32_0 = arith.constant 0 : i32
    %2 = arith.cmpi ne, %1, %c0_i32_0 : i32
    scf.if %2 {
      %cst_16 = arith.constant 0.000000e+00 : f32
      %20 = vector.broadcast %cst_16 : f32 to vector<24x128xf32>
      %c0_17 = arith.constant 0 : index
      %c0_18 = arith.constant 0 : index
      %21 = vector.load %arg8[%c0_17, %c0_18] : memref<24x128xf32, #tpu.memory_space<vmem>>, vector<24x128xf32>
      tpu.vector_store %arg8[%c0_17, %c0_18], %20 {strides = array<i32>} : memref<24x128xf32, #tpu.memory_space<vmem>>, vector<24x128xf32>,
    } else {
    }
    %c0 = arith.constant 0 : index
    %c0_1 = arith.constant 0 : index
    %3 = vector.load %arg2[%c0, %c0_1] : memref<24x128xbf16, #tpu.memory_space<vmem>>, vector<24x128xbf16>
    %c0_2 = arith.constant 0 : index
    %c0_3 = arith.constant 0 : index
    %4 = vector.load %arg3[%c0_2, %c0_3] : memref<128x256xbf16, #tpu.memory_space<vmem>>, vector<128x256xbf16>
    %cst = arith.constant dense<0.000000e+00> : vector<24x256xf32>
    %5 = tpu.matmul %3, %4, %cst {dimension_numbers = #tpu.dot_dimension_numbers<[1], [0], [0], [1], [0, 0, 1, 1], [], []>} : vector<24x128xbf16>, vector<128x256xbf16>, vector<24x256xf32> -> vector<24x256xf32>
    %c0_4 = arith.constant 0 : index
    %c0_5 = arith.constant 0 : index
    %6 = vector.load %arg4[%c0_4, %c0_5] : memref<1x256xf32, #tpu.memory_space<vmem>>, vector<1x256xf32>
    %7 = vector.broadcast %6 : vector<1x256xf32> to vector<24x256xf32>
    %8 = arith.addf %5, %7 : vector<24x256xf32>
    %cst_6 = arith.constant 0.000000e+00 : f32
    %9 = vector.broadcast %cst_6 : f32 to vector<24x256xf32>
    %10 = arith.maximumf %8, %9 : vector<24x256xf32>
    %c0_7 = arith.constant 0 : index
    %c0_8 = arith.constant 0 : index
    %11 = vector.load %arg8[%c0_7, %c0_8] : memref<24x128xf32, #tpu.memory_space<vmem>>, vector<24x128xf32>
    %12 = arith.truncf %10 : vector<24x256xf32> to vector<24x256xbf16>
    %c0_9 = arith.constant 0 : index
    %c0_10 = arith.constant 0 : index
    %13 = vector.load %arg5[%c0_9, %c0_10] : memref<256x128xbf16, #tpu.memory_space<vmem>>, vector<256x128xbf16>
    %cst_11 = arith.constant dense<0.000000e+00> : vector<24x128xf32>
    %14 = tpu.matmul %12, %13, %cst_11 {dimension_numbers = #tpu.dot_dimension_numbers<[1], [0], [0], [1], [0, 0, 1, 1], [], []>} : vector<24x256xbf16>, vector<256x128xbf16>, vector<24x128xf32> -> vector<24x128xf32>
    %15 = arith.addf %11, %14 : vector<24x128xf32>
    %c0_12 = arith.constant 0 : index
    %c0_13 = arith.constant 0 : index
    %16 = vector.load %arg8[%c0_12, %c0_13] : memref<24x128xf32, #tpu.memory_space<vmem>>, vector<24x128xf32>
    tpu.vector_store %arg8[%c0_12, %c0_13], %15 {strides = array<i32>} : memref<24x128xf32, #tpu.memory_space<vmem>>, vector<24x128xf32>,
    %c0_i32_14 = arith.constant 0 : i32
    %17 = arith.cmpi eq, %arg1, %c0_i32_14 : i32
    %18 = arith.extui %17 : i1 to i32
    %c0_i32_15 = arith.constant 0 : i32
    %19 = arith.cmpi ne, %18, %c0_i32_15 : i32
    scf.if %19 {
      %c0_16 = arith.constant 0 : index
      %c0_17 = arith.constant 0 : index
      %20 = vector.load %arg8[%c0_16, %c0_17] : memref<24x128xf32, #tpu.memory_space<vmem>>, vector<24x128xf32>
      %c0_18 = arith.constant 0 : index
      %c0_19 = arith.constant 0 : index
      %21 = vector.load %arg6[%c0_18, %c0_19] : memref<1x128xf32, #tpu.memory_space<vmem>>, vector<1x128xf32>
      %22 = vector.broadcast %21 : vector<1x128xf32> to vector<24x128xf32>
      %23 = arith.addf %20, %22 : vector<24x128xf32>
      %c0_20 = arith.constant 0 : index
      %c0_21 = arith.constant 0 : index
      %24 = vector.load %arg7[%c0_20, %c0_21] : memref<24x128xf32, #tpu.memory_space<vmem>>, vector<24x128xf32>
      tpu.vector_store %arg7[%c0_20, %c0_21], %23 {strides = array<i32>} : memref<24x128xf32, #tpu.memory_space<vmem>>, vector<24x128xf32>,
    } else {
    }
    return
  }
  func.func @transform_0(%arg0: i32, %arg1: i32) -> (i32, i32) {
    %c0_i32 = arith.constant 0 : i32
    %c0_i32_0 = arith.constant 0 : i32
    return %arg0, %c0_i32 : i32, i32
  }
  func.func @transform_1(%arg0: i32, %arg1: i32) -> (i32, i32) {
    %c0_i32 = arith.constant 0 : i32
    %c0_i32_0 = arith.constant 0 : i32
    return %c0_i32, %arg1 : i32, i32
  }
  func.func @transform_2(%arg0: i32, %arg1: i32) -> (i32, i32) {
    %c0_i32 = arith.constant 0 : i32
    %c0_i32_0 = arith.constant 0 : i32
    return %c0_i32, %arg1 : i32, i32
  }
  func.func @transform_3(%arg0: i32, %arg1: i32) -> (i32, i32) {
    %c0_i32 = arith.constant 0 : i32
    %c0_i32_0 = arith.constant 0 : i32
    return %arg1, %c0_i32 : i32, i32
  }
  func.func @transform_4(%arg0: i32, %arg1: i32) -> (i32, i32) {
    %c0_i32 = arith.constant 0 : i32
    %c0_i32_0 = arith.constant 0 : i32
    %c0_i32_1 = arith.constant 0 : i32
    return %c0_i32, %c0_i32_0 : i32, i32
  }
  func.func @transform_5(%arg0: i32, %arg1: i32) -> (i32, i32) {
    %c0_i32 = arith.constant 0 : i32
    %c0_i32_0 = arith.constant 0 : i32
    return %arg0, %c0_i32 : i32, i32
  }
}

</mosaic_0001>

<bundles_post_ra>
// kernel: tpu_custom_call.1
= control target key start
LH: loop header
LB: loop body
LE: loop exit
PB: predicated region body
PF: predicated region fallthrough
CT: control target
= control target key end

     0   :  { %10 = vsyncpa [#allocation4], 0  ;;  %s737_s0 = inlined_call_operand.hbm [shape: bf16[24,128], index: 0, kind: input, shape index: {}]   ;;  %s738_s1 = inlined_call_operand.hbm [shape: bf16[128,256], index: 1, kind: input, shape index: {}]   ;;  %s739_s2 = inlined_call_operand.vmem [shape: f32[1,256], index: 2, kind: input, shape index: {}]   ;;  %s740_s3 = inlined_call_operand.hbm [shape: bf16[256,128], index: 3, kind: input, shape index: {}]   ;;  %s741_s4 = inlined_call_operand.vmem [shape: f32[1,128], index: 4, kind: input, shape index: {}]   ;;  %s742_s5 = inlined_call_operand.hbm [shape: f32[24,128], index: 5, kind: output, shape index: {}]  }
   0x1   :  { %11 = vsyncpa [#allocation7], 0 }
   0x2   :  { %12 = vsyncpa [#allocation5], 0  ;;  %s674_s18 = smov [#allocation6]  }
   0x3   :  { %s30_s19 = sshll.u32 %s674_s18, 4  ;;  %s31_s19 = int_to_ptr.vmem [resolvable:$true] %s30_s19 }
   0x4   :  { %s596_s20 = scalar_lea.vmem %s31_s19, 2048  ;;  %p601_p1 = scmp.lt.s32.totalorder %s31_s19, %s31_s19 }
   0x5   :  { %p597_p0 = scmp.ne.s32.totalorder %s31_s19, %s596_s20  ;;  %p602_p2 = scmp.lt.s32.totalorder %s596_s20, %s596_s20 }
   0x7   :  { %p603_p3 = por %p602_p2, %p601_p1 }
   0x9   :  { %p604_p4 = pnand %p603_p3, %p597_p0 }
   0xb   :  { %607 = shalt.err (!%p604_p4)
}
   0xc   :  { %s675_s21 = smov 128   ;;  %s676_s22 = smov 8  }
   0xd   :  { %36 = dma.hbm_to_vmem [thread:$0]  %s738_s1, 2048, %s31_s19, [#allocation7], %s675_s21, %s675_s21, %s676_s22  }
   0xe   :  { %s677_s25 = smov [#allocation3]  }
   0xf   :  { %s18_s26 = sshll.u32 %s677_s25, 4  ;;  %s19_s26 = int_to_ptr.vmem [resolvable:$true] %s18_s26 }
  0x10   :  { %s616_s27 = scalar_lea.vmem %s19_s26, 192  ;;  %p621_p6 = scmp.lt.s32.totalorder %s19_s26, %s19_s26 }
  0x11   :  { %p617_p5 = scmp.ne.s32.totalorder %s19_s26, %s616_s27  ;;  %p622_p7 = scmp.lt.s32.totalorder %s616_s27, %s616_s27 }
  0x13   :  { %p623_p8 = por %p622_p7, %p621_p6 }
  0x15   :  { %p624_p9 = pnand %p623_p8, %p617_p5 }
  0x17   :  { %627 = shalt.err (!%p624_p9)
}
  0x18   :  { %s678_s28 = smov 64   ;;  %s679_s29 = smov 4  }
  0x19   :  { %24 = dma.hbm_to_vmem [thread:$0]  %s737_s0, 192, %s19_s26, [#allocation4], %s678_s28, %s678_s28, %s679_s29  }
  0x1a   :  { %s680_s7 = smov [#allocation8]  }
  0x1b   :  { %s44_s8 = sshll.u32 %s680_s7, 4  ;;  %s45_s8 = int_to_ptr.vmem [resolvable:$true] %s44_s8 }
  0x1c   :  { %s636_s1 = scalar_lea.vmem %s45_s8, 2048  ;;  %p641_p11 = scmp.lt.s32.totalorder %s45_s8, %s45_s8 }
  0x1d   :  { %p637_p10 = scmp.ne.s32.totalorder %s45_s8, %s636_s1  ;;  %p642_p12 = scmp.lt.s32.totalorder %s636_s1, %s636_s1 }
  0x1f   :  { %p643_p13 = por %p642_p12, %p641_p11 }
  0x21   :  { %p644_p0 = pnand %p643_p13, %p637_p10 }
  0x23   :  { %647 = shalt.err (!%p644_p0)
}
  0x24   :  { %50 = dma.hbm_to_vmem [thread:$0]  %s740_s3, 2048, %s45_s8, [#allocation7], %s678_s28, %s678_s28, %s679_s29  }
  0x25   :  { %668 = dma.done.wait [#allocation4], 192  }
  0x26   :  { %669 = vsyncadd [#allocation4], 4294967104 }
  0x27   :  { %670 = dma.done.wait [#allocation7], 4096  }
  0x28   :  { %671 = vsyncadd [#allocation7], 4294963200  ;;  %v681_v0 = vmov 0   ;;  %v546_v1 = vld [vmem:[#allocation6 + $0x74] ss:$8 sps:$4 sm:$0xff]   ;;  %v576_v16 = vld [vmem:[#allocation8 + $0x68] sm:$0xff]   ;;  %v91_v35 = vlaneseq }
  0x29   :  { %223 = vmatprep.mubr.bf16.mxu0 %v681_v0  ;;  %v548_v2 = vld [vmem:[#allocation6 + $0x70] ss:$8 sps:$4 sm:$0xff]   ;;  %191 = vmatprep.subr.bf16.mxu0 %v546_v1  ;;  %v549_v3 = vld [vmem:[#allocation6 + $0x64] ss:$8 sps:$4 sm:$0xff]   ;;  %v551_v4 = vld [vmem:[#allocation6 + $0x60] ss:$8 sps:$4 sm:$0xff]  }
  0x2a   :  { %192 = vmatpush1.bf16.msra.mxu0 %v548_v2  ;;  %v552_v5 = vld [vmem:[#allocation6 + $0x54] ss:$8 sps:$4 sm:$0xff]   ;;  %v554_v6 = vld [vmem:[#allocation6 + $0x50] ss:$8 sps:$4 sm:$0xff]   ;;  %v555_v7 = vld [vmem:[#allocation6 + $0x44] ss:$8 sps:$4 sm:$0xff]  }
  0x2b   :  { %193 = vmatprep.subr.bf16.mxu0 %v549_v3  ;;  %v557_v8 = vld [vmem:[#allocation6 + $0x40] ss:$8 sps:$4 sm:$0xff]   ;;  %v558_v9 = vld [vmem:[#allocation6 + $0x34] ss:$8 sps:$4 sm:$0xff]   ;;  %v560_v10 = vld [vmem:[#allocation6 + $0x30] ss:$8 sps:$4 sm:$0xff]  }
  0x2c   :  { %v572_v11 = vld [vmem:[#allocation8 + $0x78] sm:$0xff]   ;;  %v561_v12 = vld [vmem:[#allocation6 + $0x24] ss:$8 sps:$4 sm:$0xff]   ;;  %v574_v14 = vld [vmem:[#allocation8 + $0x70] sm:$0xff]   ;;  %v92_v36 = vshrl.u32 %v91_v35, 7  ;;  %s682_s12 = smov [#allocation9]  }
  0x2d   :  { %v573_v13 = vld [vmem:[#allocation8 + $0x38] sm:$0xff]   ;;  %509 = vmatprep.subr.bf16.mxu1 %v572_v11  ;;  %v575_v15 = vld [vmem:[#allocation8 + $0x30] sm:$0xff]   ;;  %v563_v17 = vld [vmem:[#allocation6 + $0x20] ss:$8 sps:$4 sm:$0xff]   ;;  %s461_s13 = sshll.u32 %s682_s12, 4  ;;  %s462_s13 = int_to_ptr.vmem [resolvable:$true] %s461_s13 }
  0x2e   :  { %194 = vmatpush1.bf16.msra.mxu0 %v551_v4  ;;  %510 = vmatpush3.bf16.msra.mxu1 %v573_v13  ;;  %v564_v18 = vld [vmem:[#allocation6 + $0x14] ss:$8 sps:$4 sm:$0xff]   ;;  %v577_v19 = vld [vmem:[#allocation8 + $0x28] sm:$0xff]   ;;  %v566_v20 = vld [vmem:[#allocation6 + $0x10] ss:$8 sps:$4 sm:$0xff]   ;;  %v97_v37 = vsub.s32 1, %v92_v36  ;;  %p653_p2 = scmp.lt.s32.totalorder %s462_s13, %s462_s13 }
  0x2f   :  { %195 = vmatprep.subr.bf16.mxu0 %v552_v5  ;;  %511 = vmatprep.subr.bf16.mxu1 %v574_v14  ;;  %v578_v21 = vld [vmem:[#allocation8 + $0x60] sm:$0xff]   ;;  %v580_v24 = vld [vmem:[#allocation8 + $0x58] sm:$0xff]   ;;  %v582_v29 = vld [vmem:[#allocation8 + $0x50] sm:$0xff]   ;;  %v93_v38 = vsub.s32 0, %v92_v36  ;;  %s648_s14 = scalar_lea.vmem %s462_s13, 384 }
  0x30   :  { %v567_v22 = vld [vmem:[#allocation6 + $0x4] ss:$8 sps:$4 sm:$0xff]   ;;  %v569_v25 = vld [vmem:[#allocation6] ss:$8 sps:$4 sm:$0xff]   ;;  %v581_v26 = vld [vmem:[#allocation8 + $0x18] sm:$0xff]   ;;  %p649_p1 = scmp.ne.s32.totalorder %s462_s13, %s648_s14  ;;  %p654_p3 = scmp.lt.s32.totalorder %s648_s14, %s648_s14 }
  0x31   :  { %v579_v23 = vld [vmem:[#allocation8 + $0x20] sm:$0xff]   ;;  %v570_v27 = vld [vmem:[#allocation3] sm:$0xff]   ;;  %v571_v28 = vld [vmem:[#allocation3 + $0x8] ss:$0 sps:$4 sm:$0xff]  }
  0x32   :  { %196 = vmatpush1.bf16.msra.mxu0 %v554_v6  ;;  %512 = vmatpush3.bf16.msra.mxu1 %v575_v15  ;;  %v583_v30 = vld [vmem:[#allocation8 + $0x10] sm:$0xff]   ;;  %v584_v31 = vld [vmem:[#allocation8 + $0x48] sm:$0xff]   ;;  %v586_v33 = vld [vmem:[#allocation8 + $0x40] sm:$0xff]   ;;  %p655_p4 = por %p654_p3, %p653_p2 }
  0x33   :  { %197 = vmatprep.subr.bf16.mxu0 %v555_v7  ;;  %513 = vmatprep.subr.bf16.mxu1 %v576_v16  ;;  %v585_v32 = vld [vmem:[#allocation8 + $0x8] sm:$0xff]   ;;  %v587_v34 = vld [vmem:[#allocation8] sm:$0xff]   ;;  %v89_v39 = vld [vmem:[%s739_s2] sm:$0x3] }
  0x34   :  { %v98_v41 = vrot.slane %v89_v39, %v97_v37  ;;  %v94_v42 = vrot.slane %v89_v39, %v93_v38  ;;  %v508_v4 = vld [vmem:[%s741_s4] ss:$0 sm:$0xff]  ;;  %p656_p5 = pnand %p655_p4, %p649_p1 }
  0x36   :  { %198 = vmatpush1.bf16.msra.mxu0 %v557_v8  ;;  %514 = vmatpush3.bf16.msra.mxu1 %v577_v19 }
  0x37   :  { %199 = vmatprep.subr.bf16.mxu0 %v558_v9  ;;  %515 = vmatprep.subr.bf16.mxu1 %v578_v21 }
  0x3a   :  { %200 = vmatpush1.bf16.msra.mxu0 %v560_v10  ;;  %516 = vmatpush3.bf16.msra.mxu1 %v579_v23 }
  0x3b   :  { %201 = vmatprep.subr.bf16.mxu0 %v561_v12  ;;  %517 = vmatprep.subr.bf16.mxu1 %v580_v24 }
  0x3e   :  { %202 = vmatpush1.bf16.msra.mxu0 %v563_v17  ;;  %518 = vmatpush3.bf16.msra.mxu1 %v581_v26 }
  0x3f   :  { %203 = vmatprep.subr.bf16.mxu0 %v564_v18  ;;  %519 = vmatprep.subr.bf16.mxu1 %v582_v29 }
  0x42   :  { %204 = vmatpush1.bf16.msra.mxu0 %v566_v20  ;;  %520 = vmatpush3.bf16.msra.mxu1 %v583_v30 }
  0x43   :  { %205 = vmatprep.subr.bf16.mxu0 %v567_v22  ;;  %521 = vmatprep.subr.bf16.mxu1 %v584_v31 }
  0x46   :  { %206 = vmatpush1.bf16.msra.mxu0 %v569_v25  ;;  %522 = vmatpush3.bf16.msra.mxu1 %v585_v32 }
  0x47   :  { %523 = vmatprep.subr.bf16.mxu1 %v586_v33 }
  0x49   :  { %224 = vmatmul.mubr.bf16.vlgmr.msra.gmra.mxu0 %v570_v27 }
  0x4a   :  { %233 = vmatprep.mubr.bf16.mxu0 %v681_v0  ;;  %524 = vmatpush3.bf16.msra.mxu1 %v587_v34 }
  0x51   :  { %234 = vmatmul.mubr.bf16.gmra.mxu0 %v571_v28 }
 0x109   :  { %v225_v40 = vpop.f32.mrf.mxu0 }
 0x10a   :  { %v226_v47 = vadd.f32 %v225_v40, %v94_v42 }
 0x10b   :  { %v227_v43 = vpop.f32.mrf.mxu0 }
 0x10c   :  { %v228_v45 = vadd.f32 %v227_v43, %v98_v41  ;;  %v242_v54 = vmax.f32 %v226_v47, 0.0 }
 0x10d   :  { %v229_v44 = vpop.f32.mrf.mxu0 }
 0x10e   :  { %v230_v46 = vadd.f32 %v229_v44, %v94_v42  ;;  %v243_v52 = vmax.f32 %v228_v45, 0.0 }
 0x10f   :  { %v231_v48 = vpop.f32.mrf.mxu0 }
 0x110   :  { %v232_v49 = vadd.f32 %v231_v48, %v98_v41  ;;  %v244_v50 = vmax.f32 %v230_v46, 0.0 }
 0x111   :  { %v235_v51 = vpop.f32.mrf.mxu0 }
 0x112   :  { %v245_v53 = vmax.f32 %v232_v49, 0.0  ;;  %v251_v58 = vpack.c.bf16 %v244_v50, %v242_v54  ;;  %v236_v59 = vadd.f32 %v235_v51, %v94_v42 }
 0x113   :  { %v237_v55 = vpop.f32.mrf.mxu0 }
 0x114   :  { %v238_v56 = vadd.f32 %v237_v55, %v98_v41  ;;  %v252_v57 = vpack.c.bf16 %v245_v53, %v243_v52  ;;  %v246_v0 = vmax.f32 %v236_v59, 0.0 }
 0x115   :  { %v239_v60 = vpop.f32.mrf.mxu0 }
 0x116   :  { %v247_v61 = vmax.f32 %v238_v56, 0.0  ;;  %415 = vmatprep.mubr.bf16.mxu1 %v252_v57  ;;  %v253_v1 = vpack.c.bf16 %v246_v0, %v246_v0 }
 0x117   :  { %v240_v62 = vpop.f32.mrf.mxu0  ;;  %416 = vmatmul.mubr.bf16.vlgmr.msra.gmra.mxu1 %v251_v58 }
 0x118   :  { %v254_v63 = vpack.c.bf16 %v247_v61, %v247_v61 }
 0x11a   :  { %423 = vmatprep.mubr.bf16.mxu1 %v254_v63 }
 0x11f   :  { %424 = vmatmul.mubr.bf16.gmra.mxu1 %v253_v1 }
 0x1d7   :  { %v525_v2 = vpop.f32.mrf.mxu1 }
 0x1d9   :  { %v526_v3 = vpop.f32.mrf.mxu1 }
 0x1da   :  { %v527_v5 = vadd.f32 %v526_v3, %v525_v2 }
 0x1db   :  { %v528_v6 = vpop.f32.mrf.mxu1 }
 0x1dc   :  { %v450_v7 = vadd.f32 %v527_v5, %v508_v4 }
 0x1dd   :  { %v529_v8 = vpop.f32.mrf.mxu1 }
 0x1de   :  { %453 = vst [vmem:[#allocation9] sm:$0xff] %v450_v7  ;;  %v530_v9 = vadd.f32 %v529_v8, %v528_v6 }
 0x1df   :  { %v531_v10 = vpop.f32.mrf.mxu1 }
 0x1e0   :  { %v451_v11 = vadd.f32 %v530_v9, %v508_v4 }
 0x1e1   :  { %v532_v12 = vpop.f32.mrf.mxu1 }
 0x1e2   :  { %454 = vst [vmem:[#allocation9 + $0x8] sm:$0xff] %v451_v11  ;;  %v533_v13 = vadd.f32 %v532_v12, %v531_v10 }
 0x1e3   :  { %v534_v14 = vpop.f32.mrf.mxu1 }
 0x1e4   :  { %v452_v15 = vadd.f32 %v533_v13, %v508_v4 }
 0x1e5   :  { %v535_v16 = vpop.f32.mrf.mxu1 }
 0x1e6   :  { %455 = vst [vmem:[#allocation9 + $0x10] sm:$0xff] %v452_v15 }
 0x1e7   :  { %659 = shalt.err (!%p656_p5)
}
 0x1e8   :  { %467 = dma.vmem_to_hbm [thread:$0]  %s462_s13, 384, %s742_s5, [#allocation5], %s675_s21, %s675_s21, %s676_s22  }
 0x1e9   :  { %672 = dma.done.wait [#allocation5], 384  }
 0x1ea   :  { %673 = vsyncadd [#allocation5], 4294966912 }
 0x1eb   :  { %471 = vsyncpa [#allocation4], 1 }
 0x1ec   :  { %472 = vsyncpa [#allocation7], 1 }
 0x1ed   :  { %473 = vsyncpa [#allocation5], 1 }

</bundles_post_ra>
